<compile_context>
chip_gen: v7x
topology: tpu7x:2x2x1
jax: 0.10.0
libtpu: 0.0.40
codegen_flags: <defaults>
</compile_context>

<pallas_src>
import jax
import jax.numpy as jnp
from jax.experimental import pallas as pl
from jax.experimental.pallas import tpu as pltpu

import numpy as np

_LANES = 128
_GRANULE = 8 * _LANES          # 1024: one full (8, 128) vreg of batch elements
_MAX_TILE_B = 16 * _GRANULE    # 16384: VMEM-capped default batch tile


def _atan2_approx(y, x):
    """Element-wise atan2 built from basic VPU/EUP ops (abs/min/max/rcp/where)."""
    ax = jnp.abs(x)
    ay = jnp.abs(y)
    mx = jnp.maximum(ax, ay)
    mn = jnp.minimum(ax, ay)
    # Guard 0/0 (atan2(0, 0) == 0, matching torch) -- also covers the padded
    # batch columns, which are exactly (0, 0).  Approx reciprocal is a single
    # EUP op; its error is below the polynomial's ~1e-4 rad error.
    inv = pl.reciprocal(jnp.maximum(mx, jnp.float32(1e-30)), approx=True)
    t = mn * inv
    s = t * t
    # Minimax polynomial approximation of atan(t) on [0, 1].
    p = ((jnp.float32(-0.0464964749) * s + jnp.float32(0.15931422)) * s
         - jnp.float32(0.327622764)) * s * t + t
    half_pi = jnp.float32(np.pi / 2.0)
    pi = jnp.float32(np.pi)
    p = jnp.where(ay > ax, half_pi - p, p)   # |y| > |x|  ->  atan swaps args
    p = jnp.where(x < 0.0, pi - p, p)        # left half-plane
    p = jnp.where(y < 0.0, -p, p)            # lower half-plane
    # TODO(synk): y == -0.0 returns +pi here where torch.atan2 returns -pi.
    return p


def polarnet_kernel(x_ref, p_ref, b2_ref, o_ref):
    # x_ref : (2, R, 128)    batch packed on sublanes (R) x lanes (128)
    # p_ref : (4, H, 1, 128) packed, lane-replicated params:
    #                        [0]=W1[:,r]  [1]=W1[:,a]  [2]=b1  [3]=W2
    # b2_ref: (1,)           SMEM scalar
    # o_ref : (R, 128)       dense output slab
    px = x_ref[0]                            # (R, 128)
    py = x_ref[1]                            # (R, 128)

    # Polar transform on fully-populated (8, 128) vregs.
    r = jnp.sqrt(px * px + py * py)          # (R, 128)
    a = _atan2_approx(py, px)                # (R, 128)

    w1r = p_ref[0]                           # (H, 1, 128)
    w1a = p_ref[1]
    b1 = p_ref[2]
    w2 = p_ref[3]

    # Hidden layer: K=2 "matmul" as broadcast FMAs over a dense (H, R, 128)
    # slab (only size-1 dims are broadcast -> no in-kernel relayout).
    pre = w1r * r[None, :, :] + w1a * a[None, :, :] + b1      # (H, R, 128)
    hid = jnp.tanh(pre)                                       # EUP, dense

    # Output layer: N_out=1 "matmul" as weighted sum over the leading H axis.
    z = jnp.sum(hid * w2, axis=0) + b2_ref[0]                 # (R, 128)

    # Numerically-stable sigmoid via tanh (no exp overflow, stays on the EUP).
    o_ref[...] = 0.5 * (jnp.tanh(0.5 * z) + 1.0)


def polarnet_forward_planar(xt, w1, b1, w2, b2, *, tile_b=None):
    """Relayout-free call boundary.

    xt: (2, N) planar input (row 0 = x coords, row 1 = y coords)
    w1: (2, H); b1: (H,); w2: (H, 1); b2: (1,).   Returns (N,) f32.
    """
    _, N = xt.shape
    H = w1.shape[1]

    if tile_b is None:
        n_gran = -(-N // _GRANULE)
        # Big VMEM-capped tiles, but keep >= 2 grid steps when there is enough
        # work so both v7x TensorCores get a share (harmless on v5e/v6e).
        tile_b = min(_MAX_TILE_B // _GRANULE, max(1, -(-n_gran // 2))) * _GRANULE
    assert tile_b % _GRANULE == 0, "batch tile must be a multiple of 1024"

    n_pad = -(-N // tile_b) * tile_b
    xt = xt.astype(jnp.float32)
    if n_pad != N:
        xt = jnp.pad(xt, ((0, 0), (0, n_pad - N)))

    s_total = n_pad // _LANES
    rows = tile_b // _LANES
    x3 = xt.reshape(2, s_total, _LANES)       # contiguous split -> free

    # Packed, lane-replicated parameter block: one small DMA per grid step.
    pk = jnp.stack([w1[0], w1[1], b1, w2[:, 0]], axis=0).astype(jnp.float32)
    pk = jnp.broadcast_to(pk[:, :, None, None], (4, H, 1, _LANES))
    b2_k = b2.reshape(1).astype(jnp.float32)

    grid = (n_pad // tile_b,)
    out2d = pl.pallas_call(
        polarnet_kernel,
        out_shape=jax.ShapeDtypeStruct((s_total, _LANES), jnp.float32),
        grid_spec=pltpu.PrefetchScalarGridSpec(
            num_scalar_prefetch=0,
            grid=grid,
            in_specs=[
                pl.BlockSpec((2, rows, _LANES), lambda i: (0, i, 0)),     # batch
                pl.BlockSpec((4, H, 1, _LANES), lambda i: (0, 0, 0, 0)),  # params
                pl.BlockSpec(memory_space=pltpu.MemorySpace.SMEM),        # b2
            ],
            out_specs=pl.BlockSpec((rows, _LANES), lambda i: (i, 0)),
        ),
        compiler_params=pltpu.CompilerParams(
            dimension_semantics=("parallel",),
            vmem_limit_bytes=32 * 1024 * 1024,
        ),
    )(x3, pk, b2_k)

    # Relayout-free output path: contiguous reshape + slice only.
    return out2d.reshape(n_pad)[:N]


def polarnet_forward(x, w1, b1, w2, b2, *, tile_b=None):
    """Module-faithful API: x (N, 2) -> (N, 1).

    Keeps exactly one XLA transpose at the boundary; callers that can supply
    planar (2, N) input should use `polarnet_forward_planar` and skip it.
    """
    N = x.shape[0]
    out = polarnet_forward_planar(jnp.transpose(x), w1, b1, w2, b2,
                                  tile_b=tile_b)
    return out.reshape(N, 1)


def polarnet_reference(x, w1, b1, w2, b2):
    """Pure-JAX reference matching the PyTorch forward exactly."""
    px = x[:, 0]
    py = x[:, 1]
    r = jnp.linalg.norm(x, ord=2, axis=-1)
    a = jnp.arctan2(py, px)
    inp = jnp.stack((r, a), axis=1)
    h = jnp.tanh(inp @ w1 + b1)
    return jax.nn.sigmoid(h @ w2 + b2)


if __name__ == "__main__":
    num_hid = 32

    key = jax.random.PRNGKey(0)
    k_x, k_x2, k_w1, k_b1, k_w2, k_b2 = jax.random.split(key, 6)

    # Deterministic parameter init (PyTorch-style uniform(-1/sqrt(fan_in), .)).
    bound1 = 1.0 / np.sqrt(2.0)
    bound2 = 1.0 / np.sqrt(num_hid)
    w1 = jax.random.uniform(k_w1, (2, num_hid), jnp.float32, -bound1, bound1)
    b1 = jax.random.uniform(k_b1, (num_hid,), jnp.float32, -bound1, bound1)
    w2 = jax.random.uniform(k_w2, (num_hid, 1), jnp.float32, -bound2, bound2)
    b2 = jax.random.uniform(k_b2, (1,), jnp.float32, -bound2, bound2)

    # Small check 1: N not a multiple of 128 -> exercises the padding path
    # (padded columns hit the atan2(0, 0) guard and are sliced away).
    N1 = 1000
    x1 = jax.random.normal(k_x, (N1, 2), jnp.float32)
    out1 = jax.block_until_ready(polarnet_forward(x1, w1, b1, w2, b2))
    ref1 = polarnet_reference(x1, w1, b1, w2, b2)
    np.testing.assert_allclose(np.asarray(out1), np.asarray(ref1),
                               rtol=1e-2, atol=1e-2)

    # Small check 2: multi-step grid (tile_b=1024 -> 4 parallel grid steps),
    # exercises the tiled/megacore path.
    N2 = 4096
    x2 = jax.random.normal(k_x2, (N2, 2), jnp.float32)
    out2 = jax.block_until_ready(
        polarnet_forward(x2, w1, b1, w2, b2, tile_b=1024))
    ref2 = polarnet_reference(x2, w1, b1, w2, b2)
    np.testing.assert_allclose(np.asarray(out2), np.asarray(ref2),
                               rtol=1e-2, atol=1e-2)

    print("KERNEL_OK")
</pallas_src>

<mosaic_0001>
module attributes {stable_mosaic.version = 11 : i64} {
  func.func @polarnet_kernel(%arg0: i32, %arg1: memref<2x8x128xf32, #tpu.memory_space<vmem>>, %arg2: memref<4x32x1x128xf32, #tpu.memory_space<vmem>>, %arg3: memref<1xf32, #tpu.memory_space<smem>>, %arg4: memref<8x128xf32, #tpu.memory_space<vmem>>) attributes {dimension_semantics = [#tpu.dimension_semantics<parallel>], iteration_bounds = array<i64: 1>, scalar_prefetch = 0 : i64, scratch_operands = 0 : i64, tpu.core_type = #tpu.core_type<tc>, window_params = [{transform_indices = @transform_0, window_bounds = array<i64: 2, 8, 128>}, {pipeline_mode = #tpu.pipeline_mode<synchronous>, transform_indices = @transform_1, window_bounds = array<i64: 4, 32, 1, 128>}, {transform_indices = @transform_2, window_bounds = array<i64: 1>}, {transform_indices = @transform_3, window_bounds = array<i64: 8, 128>}]} {
    %c0 = arith.constant 0 : index
    %c0_0 = arith.constant 0 : index
    %c0_1 = arith.constant 0 : index
    %0 = vector.load %arg1[%c0, %c0_0, %c0_1] : memref<2x8x128xf32, #tpu.memory_space<vmem>>, vector<1x8x128xf32>
    %1 = vector.shape_cast %0 : vector<1x8x128xf32> to vector<8x128xf32>
    %c1 = arith.constant 1 : index
    %c0_2 = arith.constant 0 : index
    %c0_3 = arith.constant 0 : index
    %2 = vector.load %arg1[%c1, %c0_2, %c0_3] : memref<2x8x128xf32, #tpu.memory_space<vmem>>, vector<1x8x128xf32>
    %3 = vector.shape_cast %2 : vector<1x8x128xf32> to vector<8x128xf32>
    %4 = arith.mulf %1, %1 : vector<8x128xf32>
    %5 = arith.mulf %3, %3 : vector<8x128xf32>
    %6 = arith.addf %4, %5 : vector<8x128xf32>
    %7 = math.sqrt %6 : vector<8x128xf32>
    %8 = math.absf %1 : vector<8x128xf32>
    %9 = math.absf %3 : vector<8x128xf32>
    %10 = arith.maximumf %8, %9 : vector<8x128xf32>
    %11 = arith.minimumf %8, %9 : vector<8x128xf32>
    %cst = arith.constant 1.000000e-30 : f32
    %12 = vector.broadcast %cst : f32 to vector<8x128xf32>
    %13 = arith.maximumf %10, %12 : vector<8x128xf32>
    %14 = tpu.reciprocal %13 {approx = true} : vector<8x128xf32> -> vector<8x128xf32>
    %15 = arith.mulf %11, %14 : vector<8x128xf32>
    %16 = arith.mulf %15, %15 : vector<8x128xf32>
    %cst_4 = arith.constant -0.0464964733 : f32
    %17 = vector.broadcast %cst_4 : f32 to vector<8x128xf32>
    %18 = arith.mulf %17, %16 : vector<8x128xf32>
    %cst_5 = arith.constant 0.159314215 : f32
    %19 = vector.broadcast %cst_5 : f32 to vector<8x128xf32>
    %20 = arith.addf %18, %19 : vector<8x128xf32>
    %21 = arith.mulf %20, %16 : vector<8x128xf32>
    %cst_6 = arith.constant 0.327622771 : f32
    %22 = vector.broadcast %cst_6 : f32 to vector<8x128xf32>
    %23 = arith.subf %21, %22 : vector<8x128xf32>
    %24 = arith.mulf %23, %16 : vector<8x128xf32>
    %25 = arith.mulf %24, %15 : vector<8x128xf32>
    %26 = arith.addf %25, %15 : vector<8x128xf32>
    %27 = arith.cmpf ogt, %9, %8 : vector<8x128xf32>
    %cst_7 = arith.constant 1.57079637 : f32
    %28 = vector.broadcast %cst_7 : f32 to vector<8x128xf32>
    %29 = arith.subf %28, %26 : vector<8x128xf32>
    %30 = arith.select %27, %29, %26 : vector<8x128xi1>, vector<8x128xf32>
    %cst_8 = arith.constant 0.000000e+00 : f32
    %31 = vector.broadcast %cst_8 : f32 to vector<8x128xf32>
    %32 = arith.cmpf olt, %1, %31 : vector<8x128xf32>
    %cst_9 = arith.constant 3.14159274 : f32
    %33 = vector.broadcast %cst_9 : f32 to vector<8x128xf32>
    %34 = arith.subf %33, %30 : vector<8x128xf32>
    %35 = arith.select %32, %34, %30 : vector<8x128xi1>, vector<8x128xf32>
    %cst_10 = arith.constant 0.000000e+00 : f32
    %36 = vector.broadcast %cst_10 : f32 to vector<8x128xf32>
    %37 = arith.cmpf olt, %3, %36 : vector<8x128xf32>
    %cst_11 = arith.constant 0.000000e+00 : f32
    %38 = vector.broadcast %cst_11 : f32 to vector<8x128xf32>
    %39 = arith.subf %38, %35 : vector<8x128xf32>
    %40 = arith.select %37, %39, %35 : vector<8x128xi1>, vector<8x128xf32>
    %c0_12 = arith.constant 0 : index
    %c0_13 = arith.constant 0 : index
    %c0_14 = arith.constant 0 : index
    %c0_15 = arith.constant 0 : index
    %41 = vector.load %arg2[%c0_12, %c0_13, %c0_14, %c0_15] : memref<4x32x1x128xf32, #tpu.memory_space<vmem>>, vector<1x32x1x128xf32>
    %42 = vector.shape_cast %41 : vector<1x32x1x128xf32> to vector<32x1x128xf32>
    %c1_16 = arith.constant 1 : index
    %c0_17 = arith.constant 0 : index
    %c0_18 = arith.constant 0 : index
    %c0_19 = arith.constant 0 : index
    %43 = vector.load %arg2[%c1_16, %c0_17, %c0_18, %c0_19] : memref<4x32x1x128xf32, #tpu.memory_space<vmem>>, vector<1x32x1x128xf32>
    %44 = vector.shape_cast %43 : vector<1x32x1x128xf32> to vector<32x1x128xf32>
    %c2 = arith.constant 2 : index
    %c0_20 = arith.constant 0 : index
    %c0_21 = arith.constant 0 : index
    %c0_22 = arith.constant 0 : index
    %45 = vector.load %arg2[%c2, %c0_20, %c0_21, %c0_22] : memref<4x32x1x128xf32, #tpu.memory_space<vmem>>, vector<1x32x1x128xf32>
    %46 = vector.shape_cast %45 : vector<1x32x1x128xf32> to vector<32x1x128xf32>
    %c3 = arith.constant 3 : index
    %c0_23 = arith.constant 0 : index
    %c0_24 = arith.constant 0 : index
    %c0_25 = arith.constant 0 : index
    %47 = vector.load %arg2[%c3, %c0_23, %c0_24, %c0_25] : memref<4x32x1x128xf32, #tpu.memory_space<vmem>>, vector<1x32x1x128xf32>
    %48 = vector.shape_cast %47 : vector<1x32x1x128xf32> to vector<32x1x128xf32>
    %49 = vector.shape_cast %7 : vector<8x128xf32> to vector<1x8x128xf32>
    %50 = vector.broadcast %42 : vector<32x1x128xf32> to vector<32x8x128xf32>
    %51 = vector.broadcast %49 : vector<1x8x128xf32> to vector<32x8x128xf32>
    %52 = arith.mulf %50, %51 : vector<32x8x128xf32>
    %53 = vector.shape_cast %40 : vector<8x128xf32> to vector<1x8x128xf32>
    %54 = vector.broadcast %44 : vector<32x1x128xf32> to vector<32x8x128xf32>
    %55 = vector.broadcast %53 : vector<1x8x128xf32> to vector<32x8x128xf32>
    %56 = arith.mulf %54, %55 : vector<32x8x128xf32>
    %57 = arith.addf %52, %56 : vector<32x8x128xf32>
    %58 = vector.broadcast %46 : vector<32x1x128xf32> to vector<32x8x128xf32>
    %59 = arith.addf %57, %58 : vector<32x8x128xf32>
    %60 = math.tanh %59 : vector<32x8x128xf32>
    %61 = vector.broadcast %48 : vector<32x1x128xf32> to vector<32x8x128xf32>
    %62 = arith.mulf %60, %61 : vector<32x8x128xf32>
    %cst_26 = arith.constant dense<0.000000e+00> : vector<8x128xf32>
    %63 = vector.multi_reduction <add>, %62, %cst_26 [0] : vector<32x8x128xf32> to vector<8x128xf32>
    %c0_27 = arith.constant 0 : index
    %64 = memref.load %arg3[%c0_27] : memref<1xf32, #tpu.memory_space<smem>>
    %65 = vector.broadcast %64 : f32 to vector<8x128xf32>
    %66 = arith.addf %63, %65 : vector<8x128xf32>
    %cst_28 = arith.constant 5.000000e-01 : f32
    %67 = vector.broadcast %cst_28 : f32 to vector<8x128xf32>
    %68 = arith.mulf %67, %66 : vector<8x128xf32>
    %69 = math.tanh %68 : vector<8x128xf32>
    %cst_29 = arith.constant 1.000000e+00 : f32
    %70 = vector.broadcast %cst_29 : f32 to vector<8x128xf32>
    %71 = arith.addf %69, %70 : vector<8x128xf32>
    %cst_30 = arith.constant 5.000000e-01 : f32
    %72 = vector.broadcast %cst_30 : f32 to vector<8x128xf32>
    %73 = arith.mulf %72, %71 : vector<8x128xf32>
    %c0_31 = arith.constant 0 : index
    %c0_32 = arith.constant 0 : index
    %74 = vector.load %arg4[%c0_31, %c0_32] : memref<8x128xf32, #tpu.memory_space<vmem>>, vector<8x128xf32>
    tpu.vector_store %arg4[%c0_31, %c0_32], %73 {strides = array<i32>} : memref<8x128xf32, #tpu.memory_space<vmem>>, vector<8x128xf32>,
    return
  }
  func.func @transform_0(%arg0: i32) -> (i32, i32, i32) {
    %c0_i32 = arith.constant 0 : i32
    %c0_i32_0 = arith.constant 0 : i32
    %c0_i32_1 = arith.constant 0 : i32
    return %c0_i32, %arg0, %c0_i32_0 : i32, i32, i32
  }
  func.func @transform_1(%arg0: i32) -> (i32, i32, i32, i32) {
    %c0_i32 = arith.constant 0 : i32
    %c0_i32_0 = arith.constant 0 : i32
    %c0_i32_1 = arith.constant 0 : i32
    %c0_i32_2 = arith.constant 0 : i32
    %c0_i32_3 = arith.constant 0 : i32
    return %c0_i32, %c0_i32_0, %c0_i32_1, %c0_i32_2 : i32, i32, i32, i32
  }
  func.func @transform_2(%arg0: i32) -> i32 {
    %c0_i32 = arith.constant 0 : i32
    %c0_i32_0 = arith.constant 0 : i32
    return %c0_i32 : i32
  }
  func.func @transform_3(%arg0: i32) -> (i32, i32) {
    %c0_i32 = arith.constant 0 : i32
    %c0_i32_0 = arith.constant 0 : i32
    return %arg0, %c0_i32 : i32, i32
  }
}

</mosaic_0001>

<bundles_post_ra>
// kernel: tpu_custom_call.1
= control target key start
LH: loop header
LB: loop body
LE: loop exit
PB: predicated region body
PF: predicated region fallthrough
CT: control target
= control target key end

     0   :  { %9 = vsyncpa [#allocation4], 0  ;;  %s1639_s0 = inlined_call_operand.hbm [shape: f32[2,8,128], index: 0, kind: input, shape index: {}]   ;;  %s1640_s1 = inlined_call_operand.hbm [shape: f32[4,32,1,128], index: 1, kind: input, shape index: {}]   ;;  %s1641_s2 = inlined_call_operand.<no memory space> [shape: f32[1], index: 2, kind: input, shape index: {}]   ;;  %s1642_s3 = inlined_call_operand.hbm [shape: f32[8,128], index: 3, kind: output, shape index: {}]  }
   0x1   :  { %10 = vsyncpa [#allocation7], 0 }
   0x2   :  { %11 = vsyncpa [#allocation5], 0  ;;  %s1505_s12 = smov [#allocation3]   ;;  %s1433_s16 = scalar_lea.hbm %s1639_s0, 256 }
   0x3   :  { %s17_s13 = sshll.u32 %s1505_s12, 4  ;;  %p1434_p0 = scmp.ne.s32.totalorder %s1639_s0, %s1433_s16  ;;  %s18_s13 = int_to_ptr.vmem [resolvable:$true] %s17_s13 }
   0x4   :  { %p1437_p1 = scmp.lt.u32.totalorder %s1433_s16, %s1639_s0 }
   0x6   :  { %p1439_p2 = pnand %p1437_p1, %p1434_p0 }
   0x8   :  { %1442 = shalt.err (!%p1439_p2)
}
   0x9   :  { %s1443_s21 = scalar_lea.vmem %s18_s13, 256  ;;  %p1448_p4 = scmp.lt.s32.totalorder %s18_s13, %s18_s13 }
   0xa   :  { %p1444_p3 = scmp.ne.s32.totalorder %s18_s13, %s1443_s21  ;;  %p1449_p5 = scmp.lt.s32.totalorder %s1443_s21, %s1443_s21 }
   0xc   :  { %p1450_p6 = por %p1449_p5, %p1448_p4 }
   0xe   :  { %p1451_p7 = pnand %p1450_p6, %p1444_p3 }
  0x10   :  { %1454 = shalt.err (!%p1451_p7)
}
  0x11   :  { %s1506_s22 = smov 128   ;;  %s1507_s23 = smov 8  }
  0x12   :  { %23 = dma.hbm_to_vmem [thread:$0]  %s1639_s0, 256, %s18_s13, [#allocation4], %s1506_s22, %s1506_s22, %s1507_s23  }
  0x13   :  { %s1508_s26 = smov [#allocation6]   ;;  %s1455_s30 = scalar_lea.hbm %s1640_s1, 2048 }
  0x14   :  { %s29_s27 = sshll.u32 %s1508_s26, 4  ;;  %p1456_p8 = scmp.ne.s32.totalorder %s1640_s1, %s1455_s30  ;;  %s30_s27 = int_to_ptr.vmem [resolvable:$true] %s29_s27 }
  0x15   :  { %p1459_p9 = scmp.lt.u32.totalorder %s1455_s30, %s1640_s1 }
  0x17   :  { %p1461_p10 = pnand %p1459_p9, %p1456_p8 }
  0x19   :  { %1464 = shalt.err (!%p1461_p10)
}
  0x1a   :  { %s1465_s8 = scalar_lea.vmem %s30_s27, 2048  ;;  %p1470_p12 = scmp.lt.s32.totalorder %s30_s27, %s30_s27 }
  0x1b   :  { %p1466_p11 = scmp.ne.s32.totalorder %s30_s27, %s1465_s8  ;;  %p1471_p13 = scmp.lt.s32.totalorder %s1465_s8, %s1465_s8 }
  0x1d   :  { %p1472_p0 = por %p1471_p13, %p1470_p12 }
  0x1f   :  { %p1473_p1 = pnand %p1472_p0, %p1466_p11 }
  0x21   :  { %1476 = shalt.err (!%p1473_p1)
}
  0x22   :  { %s1509_s0 = smov 16   ;;  %s1510_s9 = smov 1  }
  0x23   :  { %35 = dma.hbm_to_vmem [thread:$0]  %s1640_s1, 2048, %s30_s27, [#allocation7], %s1509_s0, %s1509_s0, %s1510_s9  }
  0x24   :  { %1499 = dma.done.wait [#allocation4], 256  }
  0x25   :  { %1500 = vsyncadd [#allocation4], 4294967040 }
  0x26   :  { %1501 = dma.done.wait [#allocation7], 2048  }
  0x27   :  { %1502 = vsyncadd [#allocation7], 4294965248  ;;  %v44_v0 = vld [vmem:[#allocation3] sm:$0xff]  ;;  %v46_v1 = vld [vmem:[#allocation3 + $0x8] sm:$0xff]  ;;  %s1511_s13 = smov [#allocation8]  }
  0x28   :  { %v57_v2 = vand.u32 2147483647, %v44_v0  ;;  %v58_v3 = vand.u32 2147483647, %v46_v1  ;;  %v47_v12 = vmul.f32 %v44_v0, %v44_v0  ;;  %v48_v13 = vmul.f32 %v46_v1, %v46_v1  ;;  %v1228_v31 = vld [vmem:[#allocation6] ss:$0 sm:$0xff] }
  0x29   :  { %vm75_vm1 = vcmp.lt.f32.partialorder %v44_v0, 0.0  ;;  %vm78_vm4 = vcmp.lt.f32.partialorder %v46_v1, 0.0  ;;  %v1260_v32 = vld [vmem:[#allocation6 + $0x20] ss:$0 sm:$0xff]  ;;  %v1229_v33 = vld [vmem:[#allocation6 + $0x1] ss:$0 sm:$0xff] }
  0x2a   :  { %v59_v4 = vmax.f32 %v57_v2, %v58_v3  ;;  %v60_v6 = vmin.f32 %v57_v2, %v58_v3  ;;  %v49_v16 = vadd.f32 %v48_v13, %v47_v12  ;;  %vm72_vm0 = vcmp.gt.f32.partialorder %v58_v3, %v57_v2  ;;  %v1261_v34 = vld [vmem:[#allocation6 + $0x21] ss:$0 sm:$0xff]  ;;  %v1230_v35 = vld [vmem:[#allocation6 + $0x2] ss:$0 sm:$0xff]  ;;  %v1231_v37 = vld [vmem:[#allocation6 + $0x3] ss:$0 sm:$0xff] }
  0x2b   :  { %v1262_v36 = vld [vmem:[#allocation6 + $0x22] ss:$0 sm:$0xff]  ;;  %v1263_v38 = vld [vmem:[#allocation6 + $0x23] ss:$0 sm:$0xff]  ;;  %v1232_v41 = vld [vmem:[#allocation6 + $0x4] ss:$0 sm:$0xff] }
  0x2c   :  { %v61_v5 = vmax.f32 %v59_v4, 1e-30  ;;  %vm52_vm2 = vcmp.eq.f32.partialorder %v49_v16, inf  ;;  %v55_v26 = vand.u32 2147483648, %v49_v16  ;;  %vm54_vm3 = vcmp.eq.f32.partialorder %v49_v16, 0.0  ;;  %s1217_s14 = sshll.u32 %s1511_s13, 4  ;;  %s1218_s14 = int_to_ptr.vmem [resolvable:$true] %s1217_s14 }
  0x2d   :  { %v1264_v42 = vld [vmem:[#allocation6 + $0x24] ss:$0 sm:$0xff]  ;;  %v1233_v45 = vld [vmem:[#allocation6 + $0x5] ss:$0 sm:$0xff]  ;;  %v1234_v51 = vld [vmem:[#allocation6 + $0x6] ss:$0 sm:$0xff]  ;;  %p1482_p3 = scmp.lt.s32.totalorder %s1218_s14, %s1218_s14 }
  0x2e   :  { %1363 = vrcp.f32 %v61_v5  ;;  %v1265_v46 = vld [vmem:[#allocation6 + $0x25] ss:$0 sm:$0xff]  ;;  %v1266_v52 = vld [vmem:[#allocation6 + $0x26] ss:$0 sm:$0xff]  ;;  %v1292_v56 = vld [vmem:[#allocation6 + $0x40] ss:$0 sm:$0xff] }
  0x2f   :  { %1365 = vrsqrt.f32 %v49_v16  ;;  %v1235_v60 = vld [vmem:[#allocation6 + $0x7] ss:$0 sm:$0xff]  ;;  %v1293_v62 = vld [vmem:[#allocation6 + $0x41] ss:$0 sm:$0xff]  ;;  %v1294_v0 = vld [vmem:[#allocation6 + $0x42] ss:$0 sm:$0xff] }
  0x30   :  { %v1267_v61 = vld [vmem:[#allocation6 + $0x27] ss:$0 sm:$0xff]  ;;  %v1236_v4 = vld [vmem:[#allocation6 + $0x8] ss:$0 sm:$0xff]  ;;  %s1477_s15 = scalar_lea.vmem %s1218_s14, 128 }
  0x31   :  { %v1268_v5 = vld [vmem:[#allocation6 + $0x28] ss:$0 sm:$0xff]  ;;  %p1478_p2 = scmp.ne.s32.totalorder %s1218_s14, %s1477_s15  ;;  %p1483_p4 = scmp.lt.s32.totalorder %s1477_s15, %s1477_s15 }
  0x33   :  { %p1484_p5 = por %p1483_p4, %p1482_p3 }
  0x35   :  { %p1485_p6 = pnand %p1484_p5, %p1478_p2 }
  0x38   :  { %v1364_v7 = vpop.eup %1363 }
  0x39   :  { %v63_v8 = vmul.f32 %v1364_v7, %v60_v6  ;;  %v1366_v23 = vpop.eup %1365  ;;  %v1295_v6 = vld [vmem:[#allocation6 + $0x43] ss:$0 sm:$0xff] }
  0x3a   :  { %v51_v24 = vmul.f32 %v1366_v23, %v49_v16  ;;  %v1270_v23 = vld [vmem:[#allocation6 + $0x2a] ss:$0 sm:$0xff] }
  0x3b   :  { %v64_v9 = vmul.f32 %v63_v8, %v63_v8 }
  0x3c   :  { %v53_v28 = vsel %vm52_vm2, %v49_v16, %v51_v24  ;;  %v1297_v16 = vld [vmem:[#allocation6 + $0x45] ss:$0 sm:$0xff]  ;;  %v1298_v24 = vld [vmem:[#allocation6 + $0x46] ss:$0 sm:$0xff] }
  0x3d   :  { %v65_v10 = vmul.f32 -0.046496473, %v64_v9  ;;  %v1556_v29 = vsel %vm54_vm3, %v55_v26, %v53_v28 }
  0x3e   :  { %v404_v39 = vmul.f32 %v1228_v31, %v1556_v29  ;;  %v405_v43 = vmul.f32 %v1229_v33, %v1556_v29  ;;  %v406_v47 = vmul.f32 %v1230_v35, %v1556_v29  ;;  %v407_v49 = vmul.f32 %v1231_v37, %v1556_v29  ;;  %v1271_v33 = vld [vmem:[#allocation6 + $0x2b] ss:$0 sm:$0xff] }
  0x3f   :  { %v66_v11 = vadd.f32 0.15931422, %v65_v10  ;;  %v408_v53 = vmul.f32 %v1232_v41, %v1556_v29  ;;  %v409_v57 = vmul.f32 %v1233_v45, %v1556_v29  ;;  %v410_v1 = vmul.f32 %v1234_v51, %v1556_v29  ;;  %v1296_v10 = vld [vmem:[#allocation6 + $0x44] ss:$0 sm:$0xff]  ;;  %v1300_v41 = vld [vmem:[#allocation6 + $0x48] ss:$0 sm:$0xff] }
  0x40   :  { %v1274_v51 = vld [vmem:[#allocation6 + $0x2e] ss:$0 sm:$0xff] }
  0x41   :  { %v67_v14 = vmul.f32 %v66_v11, %v64_v9  ;;  %v411_v11 = vmul.f32 %v1235_v60, %v1556_v29  ;;  %v1325_v60 = vld [vmem:[#allocation6 + $0x61] ss:$0 sm:$0xff] }
  0x43   :  { %v1227_v15 = vadd.f32 -0.32762277, %v67_v14 }
  0x45   :  { %v69_v17 = vmul.f32 %v1227_v15, %v64_v9  ;;  %v1237_v9 = vld [vmem:[#allocation6 + $0x9] ss:$0 sm:$0xff] }
  0x46   :  { %v1269_v15 = vld [vmem:[#allocation6 + $0x29] ss:$0 sm:$0xff] }
  0x47   :  { %v70_v18 = vmul.f32 %v69_v17, %v63_v8 }
  0x49   :  { %v71_v19 = vadd.f32 %v70_v18, %v63_v8  ;;  %v1238_v18 = vld [vmem:[#allocation6 + $0xa] ss:$0 sm:$0xff] }
  0x4a   :  { %v414_v35 = vmul.f32 %v1238_v18, %v1556_v29  ;;  %v1245_v18 = vld [vmem:[#allocation6 + $0x11] ss:$0 sm:$0xff] }
  0x4b   :  { %v73_v20 = vsub.f32 1.5707964, %v71_v19 }
  0x4d   :  { %v74_v21 = vsel %vm72_vm0, %v73_v20, %v71_v19  ;;  %v412_v19 = vmul.f32 %v1236_v4, %v1556_v29 }
  0x4e   :  { %v76_v22 = vsub.f32 3.1415927, %v74_v21 }
  0x50   :  { %v77_v25 = vsel %vm75_vm1, %v76_v22, %v74_v21 }
  0x51   :  { %v79_v27 = vsub.f32 0.0, %v77_v25 }
  0x53   :  { %v1558_v30 = vsel %vm78_vm4, %v79_v27, %v77_v25  ;;  %v413_v25 = vmul.f32 %v1237_v9, %v1556_v29  ;;  %v1239_v27 = vld [vmem:[#allocation6 + $0xb] ss:$0 sm:$0xff] }
  0x54   :  { %v628_v40 = vmul.f32 %v1260_v32, %v1558_v30  ;;  %v629_v44 = vmul.f32 %v1261_v34, %v1558_v30  ;;  %v630_v48 = vmul.f32 %v1262_v36, %v1558_v30  ;;  %v631_v50 = vmul.f32 %v1263_v38, %v1558_v30  ;;  %v1299_v34 = vld [vmem:[#allocation6 + $0x47] ss:$0 sm:$0xff]  ;;  %v1240_v36 = vld [vmem:[#allocation6 + $0xc] ss:$0 sm:$0xff] }
  0x55   :  { %v632_v54 = vmul.f32 %v1264_v42, %v1558_v30  ;;  %v633_v58 = vmul.f32 %v1265_v46, %v1558_v30  ;;  %v634_v2 = vmul.f32 %v1266_v52, %v1558_v30  ;;  %v635_v12 = vmul.f32 %v1267_v61, %v1558_v30 }
  0x56   :  { %v660_v55 = vadd.f32 %v628_v40, %v404_v39  ;;  %v661_v59 = vadd.f32 %v629_v44, %v405_v43  ;;  %v662_v63 = vadd.f32 %v630_v48, %v406_v47  ;;  %v663_v3 = vadd.f32 %v631_v50, %v407_v49  ;;  %v1272_v40 = vld [vmem:[#allocation6 + $0x2c] ss:$0 sm:$0xff]  ;;  %v1241_v43 = vld [vmem:[#allocation6 + $0xd] ss:$0 sm:$0xff]  ;;  %v1301_v48 = vld [vmem:[#allocation6 + $0x49] ss:$0 sm:$0xff] }
  0x57   :  { %v664_v7 = vadd.f32 %v632_v54, %v408_v53  ;;  %v665_v13 = vadd.f32 %v633_v58, %v409_v57  ;;  %v636_v20 = vmul.f32 %v1268_v5, %v1558_v30  ;;  %v666_v21 = vadd.f32 %v634_v2, %v410_v1  ;;  %v1273_v47 = vld [vmem:[#allocation6 + $0x2d] ss:$0 sm:$0xff]  ;;  %v1242_v50 = vld [vmem:[#allocation6 + $0xe] ss:$0 sm:$0xff]  ;;  %v1243_v58 = vld [vmem:[#allocation6 + $0xf] ss:$0 sm:$0xff] }
  0x58   :  { %v884_v8 = vadd.f32 %v1292_v56, %v660_v55  ;;  %v885_v14 = vadd.f32 %v1293_v62, %v661_v59  ;;  %v886_v17 = vadd.f32 %v1294_v0, %v662_v63  ;;  %v887_v22 = vadd.f32 %v1295_v6, %v663_v3  ;;  %v1302_v55 = vld [vmem:[#allocation6 + $0x4a] ss:$0 sm:$0xff]  ;;  %v1324_v56 = vld [vmem:[#allocation6 + $0x60] ss:$0 sm:$0xff]  ;;  %v1275_v59 = vld [vmem:[#allocation6 + $0x2f] ss:$0 sm:$0xff] }
  0x59   :  { %v888_v26 = vadd.f32 %v1296_v10, %v664_v7  ;;  %v637_v28 = vmul.f32 %v1269_v15, %v1558_v30  ;;  %v667_v31 = vadd.f32 %v635_v12, %v411_v11  ;;  %v889_v32 = vadd.f32 %v1297_v16, %v665_v13  ;;  %v1303_v1 = vld [vmem:[#allocation6 + $0x4b] ss:$0 sm:$0xff]  ;;  %v1326_v2 = vld [vmem:[#allocation6 + $0x62] ss:$0 sm:$0xff]  ;;  %v1244_v6 = vld [vmem:[#allocation6 + $0x10] ss:$0 sm:$0xff] }
  0x5a   :  { %1367 = vtanh.f32 %v884_v8  ;;  %v638_v37 = vmul.f32 %v1270_v23, %v1558_v30  ;;  %v668_v38 = vadd.f32 %v636_v20, %v412_v19  ;;  %v890_v39 = vadd.f32 %v1298_v24, %v666_v21  ;;  %v1327_v7 = vld [vmem:[#allocation6 + $0x63] ss:$0 sm:$0xff]  ;;  %v1276_v12 = vld [vmem:[#allocation6 + $0x30] ss:$0 sm:$0xff]  ;;  %v1304_v13 = vld [vmem:[#allocation6 + $0x4c] ss:$0 sm:$0xff] }
  0x5b   :  { %1369 = vtanh.f32 %v885_v14  ;;  %v415_v42 = vmul.f32 %v1239_v27, %v1556_v29  ;;  %v639_v44 = vmul.f32 %v1271_v33, %v1558_v30  ;;  %v669_v45 = vadd.f32 %v637_v28, %v413_v25  ;;  %v1328_v19 = vld [vmem:[#allocation6 + $0x64] ss:$0 sm:$0xff]  ;;  %v1277_v24 = vld [vmem:[#allocation6 + $0x31] ss:$0 sm:$0xff]  ;;  %v1305_v25 = vld [vmem:[#allocation6 + $0x4d] ss:$0 sm:$0xff] }
  0x5c   :  { %1371 = vtanh.f32 %v886_v17  ;;  %v891_v46 = vadd.f32 %v1299_v34, %v667_v31  ;;  %v416_v49 = vmul.f32 %v1240_v36, %v1556_v29  ;;  %v640_v52 = vmul.f32 %v1272_v40, %v1558_v30  ;;  %v1329_v33 = vld [vmem:[#allocation6 + $0x65] ss:$0 sm:$0xff] }
  0x5d   :  { %1373 = vtanh.f32 %v887_v22  ;;  %v670_v53 = vadd.f32 %v638_v37, %v414_v35  ;;  %v892_v54 = vadd.f32 %v1300_v41, %v668_v38  ;;  %v417_v57 = vmul.f32 %v1241_v43, %v1556_v29  ;;  %v1278_v37 = vld [vmem:[#allocation6 + $0x32] ss:$0 sm:$0xff]  ;;  %v1306_v38 = vld [vmem:[#allocation6 + $0x4e] ss:$0 sm:$0xff]  ;;  %v1247_v43 = vld [vmem:[#allocation6 + $0x13] ss:$0 sm:$0xff] }
  0x5e   :  { %1375 = vtanh.f32 %v888_v26  ;;  %v641_v61 = vmul.f32 %v1273_v47, %v1558_v30  ;;  %v671_v62 = vadd.f32 %v639_v44, %v415_v42  ;;  %v893_v63 = vadd.f32 %v1301_v48, %v669_v45  ;;  %v1330_v44 = vld [vmem:[#allocation6 + $0x66] ss:$0 sm:$0xff]  ;;  %v1279_v48 = vld [vmem:[#allocation6 + $0x33] ss:$0 sm:$0xff] }
  0x5f   :  { %1377 = vtanh.f32 %v889_v32  ;;  %v418_v3 = vmul.f32 %v1242_v50, %v1556_v29  ;;  %v642_v4 = vmul.f32 %v1274_v51, %v1558_v30  ;;  %v672_v8 = vadd.f32 %v640_v52, %v416_v49  ;;  %v1246_v32 = vld [vmem:[#allocation6 + $0x12] ss:$0 sm:$0xff]  ;;  %v1307_v49 = vld [vmem:[#allocation6 + $0x4f] ss:$0 sm:$0xff] }
  0x60   :  { %1379 = vtanh.f32 %v890_v39  ;;  %v894_v9 = vadd.f32 %v1302_v55, %v670_v53  ;;  %v419_v14 = vmul.f32 %v1243_v58, %v1556_v29  ;;  %v643_v15 = vmul.f32 %v1275_v59, %v1558_v30  ;;  %v1331_v55 = vld [vmem:[#allocation6 + $0x67] ss:$0 sm:$0xff]  ;;  %v1280_v59 = vld [vmem:[#allocation6 + $0x34] ss:$0 sm:$0xff] }
  0x61   :  { %1381 = vtanh.f32 %v891_v46  ;;  %v673_v20 = vadd.f32 %v641_v61, %v417_v57  ;;  %v895_v21 = vadd.f32 %v1303_v1, %v671_v62  ;;  %v420_v26 = vmul.f32 %v1244_v6, %v1556_v29  ;;  %v1249_v1 = vld [vmem:[#allocation6 + $0x15] ss:$0 sm:$0xff] }
  0x62   :  { %1383 = vtanh.f32 %v892_v54  ;;  %v644_v34 = vmul.f32 %v1276_v12, %v1558_v30  ;;  %v674_v35 = vadd.f32 %v642_v4, %v418_v3  ;;  %v896_v36 = vadd.f32 %v1304_v13, %v672_v8  ;;  %v1248_v54 = vld [vmem:[#allocation6 + $0x14] ss:$0 sm:$0xff]  ;;  %v1281_v6 = vld [vmem:[#allocation6 + $0x35] ss:$0 sm:$0xff]  ;;  %v1250_v12 = vld [vmem:[#allocation6 + $0x16] ss:$0 sm:$0xff] }
  0x63   :  { %1385 = vtanh.f32 %v893_v63  ;;  %v421_v39 = vmul.f32 %v1245_v18, %v1556_v29  ;;  %v645_v45 = vmul.f32 %v1277_v24, %v1558_v30  ;;  %v675_v46 = vadd.f32 %v643_v15, %v419_v14  ;;  %v1333_v13 = vld [vmem:[#allocation6 + $0x69] ss:$0 sm:$0xff]  ;;  %v1310_v18 = vld [vmem:[#allocation6 + $0x52] ss:$0 sm:$0xff]  ;;  %v1334_v24 = vld [vmem:[#allocation6 + $0x6a] ss:$0 sm:$0xff] }
  0x64   :  { %v1368_v0 = vpop.eup %1367  ;;  %1387 = vtanh.f32 %v894_v9  ;;  %v897_v47 = vadd.f32 %v1305_v25, %v673_v20  ;;  %v422_v50 = vmul.f32 %v1246_v32, %v1556_v29  ;;  %v676_v57 = vadd.f32 %v644_v34, %v420_v26 }
  0x65   :  { %v1370_v5 = vpop.eup %1369  ;;  %v1140_v10 = vmul.f32 %v1368_v0, %v1324_v56  ;;  %1389 = vtanh.f32 %v895_v21  ;;  %v646_v56 = vmul.f32 %v1278_v37, %v1558_v30  ;;  %v898_v58 = vadd.f32 %v1306_v38, %v674_v35  ;;  %v1335_v37 = vld [vmem:[#allocation6 + $0x6b] ss:$0 sm:$0xff] }
  0x66   :  { %v1372_v11 = vpop.eup %1371  ;;  %v1141_v16 = vmul.f32 %v1370_v5, %v1325_v60  ;;  %1391 = vtanh.f32 %v896_v36  ;;  %v1308_v60 = vld [vmem:[#allocation6 + $0x50] ss:$0 sm:$0xff]  ;;  %v423_v61 = vmul.f32 %v1247_v43, %v1556_v29  ;;  %v647_v3 = vmul.f32 %v1279_v48, %v1558_v30  ;;  %v1252_v36 = vld [vmem:[#allocation6 + $0x18] ss:$0 sm:$0xff]  ;;  %v1336_v48 = vld [vmem:[#allocation6 + $0x6c] ss:$0 sm:$0xff] }
  0x67   :  { %v1374_v17 = vpop.eup %1373  ;;  %v1142_v22 = vmul.f32 %v1372_v11, %v1326_v2  ;;  %v1332_v2 = vld [vmem:[#allocation6 + $0x68] ss:$0 sm:$0xff]  ;;  %v677_v4 = vadd.f32 %v645_v45, %v421_v39  ;;  %v899_v5 = vadd.f32 %v1307_v49, %v675_v46  ;;  %1393 = vtanh.f32 %v897_v47  ;;  %v1253_v47 = vld [vmem:[#allocation6 + $0x19] ss:$0 sm:$0xff] }
  0x68   :  { %v1376_v23 = vpop.eup %1375  ;;  %v1143_v27 = vmul.f32 %v1374_v17, %v1327_v7  ;;  %v1172_v28 = vadd.f32 %v1141_v16, %v1140_v10  ;;  %v1309_v7 = vld [vmem:[#allocation6 + $0x51] ss:$0 sm:$0xff]  ;;  %v424_v8 = vmul.f32 %v1248_v54, %v1556_v29  ;;  %v648_v14 = vmul.f32 %v1280_v59, %v1558_v30  ;;  %v1282_v17 = vld [vmem:[#allocation6 + $0x36] ss:$0 sm:$0xff]  ;;  %v1337_v59 = vld [vmem:[#allocation6 + $0x6d] ss:$0 sm:$0xff] }
  0x69   :  { %v1378_v31 = vpop.eup %1377  ;;  %v1144_v40 = vmul.f32 %v1376_v23, %v1328_v19  ;;  %v678_v15 = vadd.f32 %v646_v56, %v422_v50  ;;  %v900_v16 = vadd.f32 %v1308_v60, %v676_v57  ;;  %1395 = vtanh.f32 %v898_v58  ;;  %v1251_v23 = vld [vmem:[#allocation6 + $0x17] ss:$0 sm:$0xff]  ;;  %v1254_v58 = vld [vmem:[#allocation6 + $0x1a] ss:$0 sm:$0xff] }
  0x6a   :  { %v1173_v41 = vadd.f32 %v1172_v28, %v1142_v22  ;;  %v1380_v42 = vpop.eup %1379  ;;  %v1145_v51 = vmul.f32 %v1378_v31, %v1329_v33  ;;  %v425_v19 = vmul.f32 %v1249_v1, %v1556_v29  ;;  %v649_v25 = vmul.f32 %v1281_v6, %v1558_v30  ;;  %v1283_v28 = vld [vmem:[#allocation6 + $0x37] ss:$0 sm:$0xff]  ;;  %v1311_v31 = vld [vmem:[#allocation6 + $0x53] ss:$0 sm:$0xff]  ;;  %v1338_v6 = vld [vmem:[#allocation6 + $0x6e] ss:$0 sm:$0xff] }
  0x6b   :  { %v1382_v53 = vpop.eup %1381  ;;  %v1146_v62 = vmul.f32 %v1380_v42, %v1330_v44  ;;  %v679_v26 = vadd.f32 %v647_v3, %v423_v61  ;;  %1397 = vtanh.f32 %v899_v5  ;;  %v426_v32 = vmul.f32 %v1250_v12, %v1556_v29  ;;  %v1312_v42 = vld [vmem:[#allocation6 + $0x54] ss:$0 sm:$0xff]  ;;  %v1255_v5 = vld [vmem:[#allocation6 + $0x1b] ss:$0 sm:$0xff] }
  0x6c   :  { %v1174_v52 = vadd.f32 %v1173_v41, %v1143_v27  ;;  %v1384_v0 = vpop.eup %1383  ;;  %v1147_v9 = vmul.f32 %v1382_v53, %v1331_v55  ;;  %v901_v27 = vadd.f32 %v1309_v7, %v677_v4  ;;  %v650_v38 = vmul.f32 %v1282_v17, %v1558_v30  ;;  %v1284_v41 = vld [vmem:[#allocation6 + $0x38] ss:$0 sm:$0xff]  ;;  %v1313_v53 = vld [vmem:[#allocation6 + $0x55] ss:$0 sm:$0xff]  ;;  %v1339_v17 = vld [vmem:[#allocation6 + $0x6f] ss:$0 sm:$0xff] }
  0x6d   :  { %v1386_v11 = vpop.eup %1385  ;;  %v1148_v20 = vmul.f32 %v1384_v0, %v1332_v2  ;;  %v680_v39 = vadd.f32 %v648_v14, %v424_v8  ;;  %1399 = vtanh.f32 %v900_v16  ;;  %v427_v43 = vmul.f32 %v1251_v23, %v1556_v29  ;;  %v1314_v0 = vld [vmem:[#allocation6 + $0x56] ss:$0 sm:$0xff]  ;;  %v1256_v16 = vld [vmem:[#allocation6 + $0x1c] ss:$0 sm:$0xff] }
  0x6e   :  { %v1175_v63 = vadd.f32 %v1174_v52, %v1144_v40  ;;  %v1388_v22 = vpop.eup %1387  ;;  %v1149_v33 = vmul.f32 %v1386_v11, %v1333_v13  ;;  %v902_v40 = vadd.f32 %v1310_v18, %v678_v15  ;;  %v651_v49 = vmul.f32 %v1283_v28, %v1558_v30  ;;  %v1285_v52 = vld [vmem:[#allocation6 + $0x39] ss:$0 sm:$0xff]  ;;  %v1315_v11 = vld [vmem:[#allocation6 + $0x57] ss:$0 sm:$0xff]  ;;  %v1340_v28 = vld [vmem:[#allocation6 + $0x70] ss:$0 sm:$0xff] }
  0x6f   :  { %v1390_v35 = vpop.eup %1389  ;;  %v1150_v44 = vmul.f32 %v1388_v22, %v1334_v24  ;;  %v681_v50 = vadd.f32 %v649_v25, %v425_v19  ;;  %1401 = vtanh.f32 %v901_v27  ;;  %v428_v54 = vmul.f32 %v1252_v36, %v1556_v29  ;;  %v1316_v22 = vld [vmem:[#allocation6 + $0x58] ss:$0 sm:$0xff]  ;;  %v1257_v27 = vld [vmem:[#allocation6 + $0x1d] ss:$0 sm:$0xff] }
  0x70   :  { %v1176_v10 = vadd.f32 %v1175_v63, %v1145_v51  ;;  %v1392_v46 = vpop.eup %1391  ;;  %v903_v51 = vadd.f32 %v1311_v31, %v679_v26  ;;  %v1151_v55 = vmul.f32 %v1390_v35, %v1335_v37  ;;  %v652_v60 = vmul.f32 %v1284_v41, %v1558_v30  ;;  %v1286_v63 = vld [vmem:[#allocation6 + $0x3a] ss:$0 sm:$0xff]  ;;  %v1317_v35 = vld [vmem:[#allocation6 + $0x59] ss:$0 sm:$0xff]  ;;  %v1341_v41 = vld [vmem:[#allocation6 + $0x71] ss:$0 sm:$0xff] }
  0x71   :  { %v1394_v57 = vpop.eup %1393  ;;  %v682_v61 = vadd.f32 %v650_v38, %v426_v32  ;;  %1403 = vtanh.f32 %v902_v40  ;;  %v429_v1 = vmul.f32 %v1253_v47, %v1556_v29  ;;  %v1152_v2 = vmul.f32 %v1392_v46, %v1336_v48  ;;  %v1258_v40 = vld [vmem:[#allocation6 + $0x1e] ss:$0 sm:$0xff]  ;;  %v1318_v46 = vld [vmem:[#allocation6 + $0x5a] ss:$0 sm:$0xff] }
  0x72   :  { %v1177_v21 = vadd.f32 %v1176_v10, %v1146_v62  ;;  %v904_v62 = vadd.f32 %v1312_v42, %v680_v39  ;;  %v653_v7 = vmul.f32 %v1285_v52, %v1558_v30  ;;  %v683_v8 = vadd.f32 %v651_v49, %v427_v43  ;;  %v1287_v10 = vld [vmem:[#allocation6 + $0x3b] ss:$0 sm:$0xff]  ;;  %v1342_v52 = vld [vmem:[#allocation6 + $0x72] ss:$0 sm:$0xff] }
  0x73   :  { %v1396_v4 = vpop.eup %1395  ;;  %1405 = vtanh.f32 %v903_v51  ;;  %v430_v12 = vmul.f32 %v1254_v58, %v1556_v29  ;;  %v1153_v13 = vmul.f32 %v1394_v57, %v1337_v59  ;;  %v654_v18 = vmul.f32 %v1286_v63, %v1558_v30  ;;  %v1259_v51 = vld [vmem:[#allocation6 + $0x1f] ss:$0 sm:$0xff]  ;;  %v1319_v57 = vld [vmem:[#allocation6 + $0x5b] ss:$0 sm:$0xff] }
  0x74   :  { %v1178_v34 = vadd.f32 %v1177_v21, %v1147_v9  ;;  %v905_v9 = vadd.f32 %v1313_v53, %v681_v50  ;;  %v684_v19 = vadd.f32 %v652_v60, %v428_v54  ;;  %1407 = vtanh.f32 %v904_v62  ;;  %v1288_v21 = vld [vmem:[#allocation6 + $0x3c] ss:$0 sm:$0xff]  ;;  %v1343_v62 = vld [vmem:[#allocation6 + $0x73] ss:$0 sm:$0xff] }
  0x75   :  { %v1398_v15 = vpop.eup %1397  ;;  %v431_v23 = vmul.f32 %v1255_v5, %v1556_v29  ;;  %v1154_v24 = vmul.f32 %v1396_v4, %v1338_v6  ;;  %v655_v31 = vmul.f32 %v1287_v10, %v1558_v30  ;;  %v685_v32 = vadd.f32 %v653_v7, %v429_v1  ;;  %v1344_v7 = vld [vmem:[#allocation6 + $0x74] ss:$0 sm:$0xff] }
  0x76   :  { %v1179_v45 = vadd.f32 %v1178_v34, %v1148_v20  ;;  %v906_v20 = vadd.f32 %v1314_v0, %v682_v61  ;;  %1409 = vtanh.f32 %v905_v9  ;;  %v1289_v34 = vld [vmem:[#allocation6 + $0x3d] ss:$0 sm:$0xff]  ;;  %v432_v36 = vmul.f32 %v1256_v16, %v1556_v29 }
  0x77   :  { %v1400_v26 = vpop.eup %1399  ;;  %v1155_v37 = vmul.f32 %v1398_v15, %v1339_v17  ;;  %v656_v42 = vmul.f32 %v1288_v21, %v1558_v30  ;;  %v686_v43 = vadd.f32 %v654_v18, %v430_v12  ;;  %v433_v47 = vmul.f32 %v1257_v27, %v1556_v29  ;;  %v1345_v15 = vld [vmem:[#allocation6 + $0x75] ss:$0 sm:$0xff]  ;;  %v1322_v18 = vld [vmem:[#allocation6 + $0x5e] ss:$0 sm:$0xff]  ;;  %v1346_v21 = vld [vmem:[#allocation6 + $0x76] ss:$0 sm:$0xff] }
  0x78   :  { %v1180_v56 = vadd.f32 %v1179_v45, %v1149_v33  ;;  %v907_v33 = vadd.f32 %v1315_v11, %v683_v8  ;;  %1411 = vtanh.f32 %v906_v20  ;;  %v1290_v45 = vld [vmem:[#allocation6 + $0x3e] ss:$0 sm:$0xff]  ;;  %v1156_v48 = vmul.f32 %v1400_v26, %v1340_v28  ;;  %v1321_v11 = vld [vmem:[#allocation6 + $0x5d] ss:$0 sm:$0xff]  ;;  %v1347_v27 = vld [vmem:[#allocation6 + $0x77] ss:$0 sm:$0xff] }
  0x79   :  { %v1402_v39 = vpop.eup %1401  ;;  %v657_v53 = vmul.f32 %v1289_v34, %v1558_v30  ;;  %v687_v54 = vadd.f32 %v655_v31, %v431_v23  ;;  %v434_v58 = vmul.f32 %v1258_v40, %v1556_v29  ;;  %v658_v63 = vmul.f32 %v1290_v45, %v1558_v30  ;;  %v1348_v34 = vld [vmem:[#allocation6 + $0x78] ss:$0 sm:$0xff] }
  0x7a   :  { %v1181_v3 = vadd.f32 %v1180_v56, %v1150_v44  ;;  %v908_v44 = vadd.f32 %v1316_v22, %v684_v19  ;;  %1413 = vtanh.f32 %v907_v33  ;;  %v1291_v56 = vld [vmem:[#allocation6 + $0x3f] ss:$0 sm:$0xff]  ;;  %v1157_v59 = vmul.f32 %v1402_v39, %v1341_v41  ;;  %v1349_v39 = vld [vmem:[#allocation6 + $0x79] ss:$0 sm:$0xff] }
  0x7b   :  { %v1404_v50 = vpop.eup %1403  ;;  %v688_v0 = vadd.f32 %v656_v42, %v432_v36  ;;  %v910_v1 = vadd.f32 %v1318_v46, %v686_v43  ;;  %v659_v8 = vmul.f32 %v1291_v56, %v1558_v30  ;;  %v689_v9 = vadd.f32 %v657_v53, %v433_v47  ;;  %v1323_v30 = vld [vmem:[#allocation6 + $0x5f] ss:$0 sm:$0xff]  ;;  %v1350_v43 = vld [vmem:[#allocation6 + $0x7a] ss:$0 sm:$0xff]  ;;  %v1351_v47 = vld [vmem:[#allocation6 + $0x7b] ss:$0 sm:$0xff] }
  0x7c   :  { %v1182_v14 = vadd.f32 %v1181_v3, %v1151_v55  ;;  %v909_v55 = vadd.f32 %v1317_v35, %v685_v32  ;;  %1415 = vtanh.f32 %v908_v44  ;;  %v435_v3 = vmul.f32 %v1259_v51, %v1556_v29  ;;  %v1352_v51 = vld [vmem:[#allocation6 + $0x7c] ss:$0 sm:$0xff] }
  0x7d   :  { %v1406_v61 = vpop.eup %1405  ;;  %v1158_v4 = vmul.f32 %v1404_v50, %v1342_v52  ;;  %v911_v10 = vadd.f32 %v1319_v57, %v687_v54  ;;  %v690_v16 = vadd.f32 %v658_v63, %v434_v58  ;;  %v913_v23 = vadd.f32 %v1321_v11, %v689_v9  ;;  %v1355_v63 = vld [vmem:[#allocation6 + $0x7f] ss:$0 sm:$0xff] }
  0x7e   :  { %v1183_v25 = vadd.f32 %v1182_v14, %v1152_v2  ;;  %v1320_v2 = vld [vmem:[#allocation6 + $0x5c] ss:$0 sm:$0xff]  ;;  %v1408_v6 = vpop.eup %1407  ;;  %1417 = vtanh.f32 %v909_v55  ;;  %v1159_v12 = vmul.f32 %v1406_v61, %v1343_v62  ;;  %v691_v22 = vadd.f32 %v659_v8, %v435_v3  ;;  %v1353_v55 = vld [vmem:[#allocation6 + $0x7d] ss:$0 sm:$0xff] }
  0x7f   :  { %v912_v17 = vadd.f32 %v1320_v2, %v688_v0  ;;  %1419 = vtanh.f32 %v910_v1  ;;  %v1160_v19 = vmul.f32 %v1408_v6, %v1344_v7  ;;  %v914_v28 = vadd.f32 %v1322_v18, %v690_v16 }
  0x80   :  { %v1184_v38 = vadd.f32 %v1183_v25, %v1153_v13  ;;  %v1410_v14 = vpop.eup %1409  ;;  %1421 = vtanh.f32 %v911_v10  ;;  %v915_v35 = vadd.f32 %v1323_v30, %v691_v22 }
  0x81   :  { %1423 = vtanh.f32 %v912_v17 }
  0x82   :  { %v1185_v49 = vadd.f32 %v1184_v38, %v1154_v24  ;;  %v1412_v20 = vpop.eup %1411  ;;  %v1161_v24 = vmul.f32 %v1410_v14, %v1345_v15  ;;  %1425 = vtanh.f32 %v913_v23 }
  0x83   :  { %v1162_v31 = vmul.f32 %v1412_v20, %v1346_v21  ;;  %1427 = vtanh.f32 %v914_v28 }
  0x84   :  { %v1186_v60 = vadd.f32 %v1185_v49, %v1155_v37  ;;  %v1414_v26 = vpop.eup %1413  ;;  %1429 = vtanh.f32 %v915_v35 }
  0x85   :  { %v1163_v36 = vmul.f32 %v1414_v26, %v1347_v27 }
  0x86   :  { %v1187_v5 = vadd.f32 %v1186_v60, %v1156_v48  ;;  %v1416_v33 = vpop.eup %1415 }
  0x87   :  { %v1164_v40 = vmul.f32 %v1416_v33, %v1348_v34 }
  0x88   :  { %v1188_v13 = vadd.f32 %v1187_v5, %v1157_v59  ;;  %v1418_v38 = vpop.eup %1417  ;;  %v1354_v59 = vld [vmem:[#allocation6 + $0x7e] ss:$0 sm:$0xff]  ;;  %v1204_v5 = vstv %s1641_s2 }
  0x89   :  { %v1420_v42 = vpop.eup %1419  ;;  %v1165_v44 = vmul.f32 %v1418_v38, %v1349_v39 }
  0x8a   :  { %v1189_v29 = vadd.f32 %v1188_v13, %v1158_v4  ;;  %v1422_v46 = vpop.eup %1421  ;;  %v1166_v48 = vmul.f32 %v1420_v42, %v1350_v43 }
  0x8b   :  { %v1424_v50 = vpop.eup %1423  ;;  %v1167_v52 = vmul.f32 %v1422_v46, %v1351_v47 }
  0x8c   :  { %v1190_v25 = vadd.f32 %v1189_v29, %v1159_v12  ;;  %v1426_v54 = vpop.eup %1425  ;;  %v1168_v56 = vmul.f32 %v1424_v50, %v1352_v51 }
  0x8d   :  { %v1428_v58 = vpop.eup %1427  ;;  %v1169_v60 = vmul.f32 %v1426_v54, %v1353_v55 }
  0x8e   :  { %v1191_v32 = vadd.f32 %v1190_v25, %v1160_v19  ;;  %v1430_v62 = vpop.eup %1429  ;;  %v1170_v0 = vmul.f32 %v1428_v58, %v1354_v59 }
  0x8f   :  { %v1171_v2 = vmul.f32 %v1430_v62, %v1355_v63 }
  0x90   :  { %v1192_v37 = vadd.f32 %v1191_v32, %v1161_v24 }
  0x92   :  { %v1193_v41 = vadd.f32 %v1192_v37, %v1162_v31 }
  0x94   :  { %v1194_v45 = vadd.f32 %v1193_v41, %v1163_v36 }
  0x96   :  { %v1195_v49 = vadd.f32 %v1194_v45, %v1164_v40 }
  0x98   :  { %v1196_v53 = vadd.f32 %v1195_v49, %v1165_v44 }
  0x9a   :  { %v1197_v57 = vadd.f32 %v1196_v53, %v1166_v48 }
  0x9c   :  { %v1198_v61 = vadd.f32 %v1197_v57, %v1167_v52 }
  0x9e   :  { %v1199_v1 = vadd.f32 %v1198_v61, %v1168_v56 }
  0xa0   :  { %v1200_v3 = vadd.f32 %v1199_v1, %v1169_v60 }
  0xa2   :  { %v1201_v4 = vadd.f32 %v1200_v3, %v1170_v0 }
  0xa4   :  { %v1202_v6 = vadd.f32 %v1201_v4, %v1171_v2 }
  0xa6   :  { %v1205_v7 = vadd.f32 %v1204_v5, %v1202_v6 }
  0xa8   :  { %v1206_v8 = vmul.f32 0.5, %v1205_v7 }
  0xaa   :  { %1431 = vtanh.f32 %v1206_v8 }
  0xb4   :  { %v1432_v9 = vpop.eup %1431 }
  0xb5   :  { %v1208_v10 = vadd.f32 1.0, %v1432_v9 }
  0xb7   :  { %v1209_v11 = vmul.f32 0.5, %v1208_v10 }
  0xb9   :  { %1210 = vst [vmem:[#allocation8] sm:$0xff] %v1209_v11 }
  0xba   :  { %1488 = shalt.err (!%p1485_p6)
}
  0xbb   :  { %s1489_s17 = scalar_lea.hbm %s1642_s3, 128 }
  0xbc   :  { %p1490_p7 = scmp.ne.s32.totalorder %s1642_s3, %s1489_s17  ;;  %p1493_p8 = scmp.lt.u32.totalorder %s1489_s17, %s1642_s3 }
  0xbe   :  { %p1495_p9 = pnand %p1493_p8, %p1490_p7 }
  0xc0   :  { %1498 = shalt.err (!%p1495_p9)
}
  0xc1   :  { %1220 = dma.vmem_to_hbm [thread:$0]  %s1218_s14, 128, %s1642_s3, [#allocation5]  }
  0xc2   :  { %1503 = dma.done.wait [#allocation5], 128  }
  0xc3   :  { %1504 = vsyncadd [#allocation5], 4294967168 }
  0xc4   :  { %1224 = vsyncpa [#allocation4], 1 }
  0xc5   :  { %1225 = vsyncpa [#allocation7], 1 }
  0xc6   :  { %1226 = vsyncpa [#allocation5], 1 }

</bundles_post_ra>
